<compile_context>
chip_gen: v6e
topology: v6e:2x2x1
jax: 0.10.0
libtpu: 0.0.40
codegen_flags: <defaults>
</compile_context>

<pallas_src>
import jax
import jax.numpy as jnp
from jax.experimental import pallas as pl
from jax.experimental.pallas import tpu as pltpu


def _round_up(x, m):
    return (x + m - 1) // m * m


def make_params(key, coordinate_dim, hidden_size):
    """Deterministic synthetic parameters, stored as (in, out) / (1, out)."""
    ks = jax.random.split(key, 5)

    def lin(k, fan_in, fan_out):
        kw, kb = jax.random.split(k)
        scale = 1.0 / jnp.sqrt(jnp.float32(fan_in))
        w = jax.random.uniform(kw, (fan_in, fan_out), jnp.float32, -scale, scale)
        b = jax.random.uniform(kb, (1, fan_out), jnp.float32, -scale, scale)
        return w, b

    h = hidden_size
    p = {}
    p["w_emb"], p["b_emb"] = lin(ks[0], coordinate_dim, h)   # node_embedding
    p["w1"], p["b1"] = lin(ks[1], 2 * h, h)                  # context_encoder[0]
    p["w2"], p["b2"] = lin(ks[2], h, h)                      # context_encoder[2]
    p["wc1"], p["bc1"] = lin(ks[3], h, h)                    # critic_head[0]
    p["wc2"], p["bc2"] = lin(ks[4], h, 1)                    # critic_head[2]
    return p


def build_a2c(coordinate_dim, hidden_size, n_nodes, block_envs=8):
    """Returns (pack_params, forward).  forward is batched over environments."""
    C, H, N = coordinate_dim, hidden_size, n_nodes
    BBLK = block_envs
    W = 128                       # lane width
    CB = 8                        # padded augmented-coordinate feature dim
    HB = _round_up(H, 8)          # padded hidden dim (contract width)
    VALUE_LANE = N                # critic value lane in the packed output
    NROW = C + 4                  # C coord rows, ones row, cur, avail, visited

    assert BBLK % 8 == 0, "block_envs must be a multiple of 8"
    assert C + 1 <= CB and HB <= W and N + 1 <= W

    # ---- packed weight slab layout (row offsets are multiples of 8) --------
    OFF_EMB = 0                   # (CB, W)  rows 0..C-1 = w_emb, row C = b_emb
    OFF_EMBT = OFF_EMB + CB       # (HB, W)  cols 0..C-1 = w_emb^T, col C = b_emb
    OFF_W1T = OFF_EMBT + HB       # (HB, W)  w1[:H]
    OFF_W1B = OFF_W1T + HB        # (HB, W)  w1[H:]
    OFF_W2 = OFF_W1B + HB         # (HB, W)
    OFF_WC1 = OFF_W2 + HB         # (HB, W)
    OFF_WC2 = OFF_WC1 + HB        # (HB, W)  only column VALUE_LANE nonzero
    OFF_B = OFF_WC2 + HB          # (8, W)   rows: b1, b2, bc1, bc2(@lane N)
    R = OFF_B + 8                 # total slab rows (208 for H=32)

    def pack_params(p):
        f32 = jnp.float32
        slab = jnp.zeros((R, W), f32)
        w_emb = p["w_emb"].astype(f32)            # (C, H)
        b_emb = p["b_emb"].astype(f32)            # (1, H)
        slab = slab.at[OFF_EMB:OFF_EMB + C, :H].set(w_emb)
        slab = slab.at[OFF_EMB + C, :H].set(b_emb[0])
        slab = slab.at[OFF_EMBT:OFF_EMBT + H, :C].set(w_emb.T)
        slab = slab.at[OFF_EMBT:OFF_EMBT + H, C].set(b_emb[0])
        slab = slab.at[OFF_W1T:OFF_W1T + H, :H].set(p["w1"][:H].astype(f32))
        slab = slab.at[OFF_W1B:OFF_W1B + H, :H].set(p["w1"][H:].astype(f32))
        slab = slab.at[OFF_W2:OFF_W2 + H, :H].set(p["w2"].astype(f32))
        slab = slab.at[OFF_WC1:OFF_WC1 + H, :H].set(p["wc1"].astype(f32))
        slab = slab.at[OFF_WC2:OFF_WC2 + H, VALUE_LANE].set(
            p["wc2"][:, 0].astype(f32))
        slab = slab.at[OFF_B + 0, :H].set(p["b1"][0].astype(f32))
        slab = slab.at[OFF_B + 1, :H].set(p["b2"][0].astype(f32))
        slab = slab.at[OFF_B + 2, :H].set(p["bc1"][0].astype(f32))
        slab = slab.at[OFF_B + 3, VALUE_LANE].set(p["bc2"][0, 0].astype(f32))
        return slab                               # (R, W) f32

    # ---- kernel (processes BBLK environments per grid step) ----------------
    def kernel(acts_ref, slab_ref, out_ref):
        f32 = jnp.float32

        def wmat(off, rows):
            return slab_ref[off:off + rows, :]

        # clean (BBLK, W) tiles out of the single packed activation block
        cur8 = acts_ref[C + 1][:, :CB]        # (BBLK, 8)  [coords(cur), 1]
        avail8 = acts_ref[C + 2][:, :CB]      # (BBLK, 8)  [mean avail coords, flag]
        vis = acts_ref[C + 3]                 # (BBLK, W)  visited flags on lanes

        # embeddings of the selected context rows: stacked M=BBLK matmuls
        w_emb_aug = wmat(OFF_EMB, CB)                                 # (8, W)
        cur_emb = jnp.dot(cur8, w_emb_aug, preferred_element_type=f32)
        avail_emb = jnp.dot(avail8, w_emb_aug, preferred_element_type=f32)

        biases = slab_ref[OFF_B:OFF_B + 8, :]                         # (8, W)
        b1, b2 = biases[0:1, :], biases[1:2, :]
        bc1, bc2 = biases[2:3, :], biases[3:4, :]

        # context encoder (W1 split into top/bottom H rows -> no concat)
        h1 = jnp.maximum(
            jnp.dot(cur_emb[:, :HB], wmat(OFF_W1T, HB), preferred_element_type=f32)
            + jnp.dot(avail_emb[:, :HB], wmat(OFF_W1B, HB), preferred_element_type=f32)
            + b1, 0.0)
        ctx = jnp.maximum(
            jnp.dot(h1[:, :HB], wmat(OFF_W2, HB), preferred_element_type=f32) + b2,
            0.0)

        # compatibility: node_embeds . ctx == coords_aug . (W_emb_aug @ ctx)
        t = jnp.dot(ctx[:, :HB], wmat(OFF_EMBT, HB),
                    preferred_element_type=f32)            # (BBLK, W), lanes 0..C
        compat = acts_ref[C] * t[:, C:C + 1]               # b_emb (homogeneous) term
        for f in range(C):
            compat = compat + acts_ref[f] * t[:, f:f + 1]

        # critic head; value lands on lane VALUE_LANE via the wc2/bc2 packing
        hc = jnp.maximum(
            jnp.dot(ctx[:, :HB], wmat(OFF_WC1, HB), preferred_element_type=f32) + bc1,
            0.0)
        val_row = (jnp.dot(hc[:, :HB], wmat(OFF_WC2, HB),
                           preferred_element_type=f32) + bc2)

        # fused lane-dense output: logits in lanes < N, value at lane N
        lane = jax.lax.broadcasted_iota(jnp.int32, (BBLK, W), 1)
        logits = jnp.where(vis > 0.5, -jnp.inf, compat)
        out_ref[...] = jnp.where(lane < N, logits, val_row)

    # ---- wrapper ------------------------------------------------------------
    def forward(slab, coordinates, current_idx, visited_mask):
        """coordinates (B,N,C) f32; current_idx (B,) int32; visited (B,N) bool.
        Returns (action_logits (B,N), state_value (B,1))."""
        f32 = jnp.float32
        B = coordinates.shape[0]
        B_pad = _round_up(B, BBLK)

        coords = coordinates.astype(f32)
        visited_f = visited_mask.astype(f32)                          # (B, N)
        avail = 1.0 - visited_f
        cnt = jnp.sum(avail, axis=1, keepdims=True)                   # (B, 1)
        inv = jnp.where(cnt > 0.0, 1.0 / jnp.maximum(cnt, 1.0), 0.0)
        availw = avail * inv                                          # (B, N)
        flag = (cnt > 0.0).astype(f32)[:, 0]                          # (B,)
        onehot = jax.nn.one_hot(current_idx, N, dtype=f32)            # (B, N)
        cur_coords = jnp.einsum('bn,bnc->bc', onehot, coords)         # (B, C)
        avail_coords = jnp.einsum('bn,bnc->bc', availw, coords)       # (B, C)

        # one lane-dense packed activation array -> one DMA per grid step
        acts = jnp.zeros((NROW, B_pad, W), f32)
        acts = acts.at[0:C, :B, 0:N].set(jnp.moveaxis(coords, 2, 0))  # node coords
        acts = acts.at[C, :B, 0:N].set(1.0)                           # homogeneous row
        acts = acts.at[C + 1, :B, 0:C].set(cur_coords)
        acts = acts.at[C + 1, :B, C].set(1.0)
        acts = acts.at[C + 2, :B, 0:C].set(avail_coords)
        acts = acts.at[C + 2, :B, C].set(flag)
        acts = acts.at[C + 3, :B, 0:N].set(visited_f)

        out = pl.pallas_call(
            kernel,
            out_shape=jax.ShapeDtypeStruct((B_pad, W), f32),
            grid_spec=pltpu.PrefetchScalarGridSpec(
                num_scalar_prefetch=0,
                grid=(B_pad // BBLK,),
                in_specs=[
                    pl.BlockSpec((NROW, BBLK, W), lambda i: (0, i, 0)),
                    pl.BlockSpec((R, W), lambda i: (0, 0)),   # weights resident
                ],
                out_specs=pl.BlockSpec((BBLK, W), lambda i: (i, 0)),
            ),
            compiler_params=pltpu.CompilerParams(
                dimension_semantics=("parallel",)),
        )(acts, slab)

        logits = out[:B, :N]
        value = out[:B, VALUE_LANE:VALUE_LANE + 1]
        return logits, value

    return pack_params, jax.jit(forward)


def a2c_forward_ref(params, coordinates, current_idx, visited_mask):
    """Pure-JAX reference mirroring the PyTorch forward (single sample)."""
    node_embeds = coordinates @ params["w_emb"] + params["b_emb"]
    current_embed = node_embeds[current_idx]
    avail = (~visited_mask).astype(jnp.float32)[:, None]
    count = avail.sum()
    available_embed = jnp.where(
        count > 0, (node_embeds * avail).sum(0) / jnp.maximum(count, 1.0),
        jnp.zeros_like(current_embed))
    context = jnp.concatenate([current_embed, available_embed])[None, :]
    h1 = jax.nn.relu(context @ params["w1"] + params["b1"])
    ctx = jax.nn.relu(h1 @ params["w2"] + params["b2"])
    compat = (node_embeds * ctx).sum(-1)
    logits = jnp.where(visited_mask, -jnp.inf, compat)
    hc = jax.nn.relu(ctx @ params["wc1"] + params["bc1"])
    value = (hc @ params["wc2"] + params["bc2"]).reshape(1)
    return logits, value


if __name__ == "__main__":
    N_NODES = 8          # TSP nodes
    COORD_DIM = 2        # (x, y)
    HIDDEN = 32
    BATCH = 16           # 2 grid steps of 8 envs each (both v7x TCs get work)

    key = jax.random.PRNGKey(0)
    kp, kc, ki, kv = jax.random.split(key, 4)

    params = make_params(kp, COORD_DIM, HIDDEN)
    pack_params, a2c_forward = build_a2c(COORD_DIM, HIDDEN, N_NODES, block_envs=8)
    slab = pack_params(params)

    coordinates = jax.random.uniform(kc, (BATCH, N_NODES, COORD_DIM), jnp.float32)
    current_idx = jax.random.randint(ki, (BATCH,), 0, N_NODES, dtype=jnp.int32)
    visited_mask = jax.random.bernoulli(kv, 0.4, (BATCH, N_NODES))
    visited_mask = visited_mask.at[0, :].set(True)    # all-visited branch
    visited_mask = visited_mask.at[1, :].set(False)   # none-visited branch

    logits, value = a2c_forward(slab, coordinates, current_idx, visited_mask)
    jax.block_until_ready((logits, value))
    assert logits.shape == (BATCH, N_NODES) and value.shape == (BATCH, 1)

    for b in range(BATCH):
        ref_logits, ref_value = a2c_forward_ref(
            params, coordinates[b], int(current_idx[b]), visited_mask[b])
        vm = visited_mask[b]
        fin = ~vm
        if bool(vm.any()):
            assert bool(jnp.all(jnp.isneginf(logits[b][vm])))
        if bool(fin.any()):
            assert bool(jnp.allclose(logits[b][fin], ref_logits[fin],
                                     rtol=1e-4, atol=1e-4))
        assert bool(jnp.allclose(value[b], ref_value, rtol=1e-4, atol=1e-4))

    print("KERNEL_OK")
</pallas_src>

<mosaic_0001>
module attributes {stable_mosaic.version = 11 : i64} {
  func.func @kernel(%arg0: i32, %arg1: memref<6x8x128xf32, #tpu.memory_space<vmem>>, %arg2: memref<208x128xf32, #tpu.memory_space<vmem>>, %arg3: memref<8x128xf32, #tpu.memory_space<vmem>>) attributes {dimension_semantics = [#tpu.dimension_semantics<parallel>], iteration_bounds = array<i64: 2>, scalar_prefetch = 0 : i64, scratch_operands = 0 : i64, tpu.core_type = #tpu.core_type<tc>, window_params = [{transform_indices = @transform_0, window_bounds = array<i64: 6, 8, 128>}, {pipeline_mode = #tpu.pipeline_mode<synchronous>, transform_indices = @transform_1, window_bounds = array<i64: 208, 128>}, {transform_indices = @transform_2, window_bounds = array<i64: 8, 128>}]} {
    %c3 = arith.constant 3 : index
    %c0 = arith.constant 0 : index
    %c0_0 = arith.constant 0 : index
    %0 = vector.load %arg1[%c3, %c0, %c0_0] : memref<6x8x128xf32, #tpu.memory_space<vmem>>, vector<1x8x128xf32>
    %1 = vector.shape_cast %0 : vector<1x8x128xf32> to vector<8x128xf32>
    %2 = vector.extract_strided_slice %1 {offsets = [0, 0], sizes = [8, 8], strides = [1, 1]} : vector<8x128xf32> to vector<8x8xf32>
    %c4 = arith.constant 4 : index
    %c0_1 = arith.constant 0 : index
    %c0_2 = arith.constant 0 : index
    %3 = vector.load %arg1[%c4, %c0_1, %c0_2] : memref<6x8x128xf32, #tpu.memory_space<vmem>>, vector<1x8x128xf32>
    %4 = vector.shape_cast %3 : vector<1x8x128xf32> to vector<8x128xf32>
    %5 = vector.extract_strided_slice %4 {offsets = [0, 0], sizes = [8, 8], strides = [1, 1]} : vector<8x128xf32> to vector<8x8xf32>
    %c5 = arith.constant 5 : index
    %c0_3 = arith.constant 0 : index
    %c0_4 = arith.constant 0 : index
    %6 = vector.load %arg1[%c5, %c0_3, %c0_4] : memref<6x8x128xf32, #tpu.memory_space<vmem>>, vector<1x8x128xf32>
    %7 = vector.shape_cast %6 : vector<1x8x128xf32> to vector<8x128xf32>
    %c0_5 = arith.constant 0 : index
    %c0_6 = arith.constant 0 : index
    %8 = vector.load %arg2[%c0_5, %c0_6] : memref<208x128xf32, #tpu.memory_space<vmem>>, vector<8x128xf32>
    %cst = arith.constant dense<0.000000e+00> : vector<8x128xf32>
    %9 = tpu.matmul %2, %8, %cst {dimension_numbers = #tpu.dot_dimension_numbers<[1], [0], [0], [1], [0, 0, 1, 1], [], []>} : vector<8x8xf32>, vector<8x128xf32>, vector<8x128xf32> -> vector<8x128xf32>
    %cst_7 = arith.constant dense<0.000000e+00> : vector<8x128xf32>
    %10 = tpu.matmul %5, %8, %cst_7 {dimension_numbers = #tpu.dot_dimension_numbers<[1], [0], [0], [1], [0, 0, 1, 1], [], []>} : vector<8x8xf32>, vector<8x128xf32>, vector<8x128xf32> -> vector<8x128xf32>
    %c200 = arith.constant 200 : index
    %c0_8 = arith.constant 0 : index
    %11 = vector.load %arg2[%c200, %c0_8] : memref<208x128xf32, #tpu.memory_space<vmem>>, vector<8x128xf32>
    %12 = vector.extract_strided_slice %11 {offsets = [0, 0], sizes = [1, 128], strides = [1, 1]} : vector<8x128xf32> to vector<1x128xf32>
    %13 = vector.extract_strided_slice %11 {offsets = [1, 0], sizes = [1, 128], strides = [1, 1]} : vector<8x128xf32> to vector<1x128xf32>
    %14 = vector.extract_strided_slice %11 {offsets = [2, 0], sizes = [1, 128], strides = [1, 1]} : vector<8x128xf32> to vector<1x128xf32>
    %15 = vector.extract_strided_slice %11 {offsets = [3, 0], sizes = [1, 128], strides = [1, 1]} : vector<8x128xf32> to vector<1x128xf32>
    %16 = vector.extract_strided_slice %9 {offsets = [0, 0], sizes = [8, 32], strides = [1, 1]} : vector<8x128xf32> to vector<8x32xf32>
    %c40 = arith.constant 40 : index
    %c0_9 = arith.constant 0 : index
    %17 = vector.load %arg2[%c40, %c0_9] : memref<208x128xf32, #tpu.memory_space<vmem>>, vector<32x128xf32>
    %cst_10 = arith.constant dense<0.000000e+00> : vector<8x128xf32>
    %18 = tpu.matmul %16, %17, %cst_10 {dimension_numbers = #tpu.dot_dimension_numbers<[1], [0], [0], [1], [0, 0, 1, 1], [], []>} : vector<8x32xf32>, vector<32x128xf32>, vector<8x128xf32> -> vector<8x128xf32>
    %19 = vector.extract_strided_slice %10 {offsets = [0, 0], sizes = [8, 32], strides = [1, 1]} : vector<8x128xf32> to vector<8x32xf32>
    %c72 = arith.constant 72 : index
    %c0_11 = arith.constant 0 : index
    %20 = vector.load %arg2[%c72, %c0_11] : memref<208x128xf32, #tpu.memory_space<vmem>>, vector<32x128xf32>
    %cst_12 = arith.constant dense<0.000000e+00> : vector<8x128xf32>
    %21 = tpu.matmul %19, %20, %cst_12 {dimension_numbers = #tpu.dot_dimension_numbers<[1], [0], [0], [1], [0, 0, 1, 1], [], []>} : vector<8x32xf32>, vector<32x128xf32>, vector<8x128xf32> -> vector<8x128xf32>
    %22 = arith.addf %18, %21 : vector<8x128xf32>
    %23 = vector.broadcast %12 : vector<1x128xf32> to vector<8x128xf32>
    %24 = arith.addf %22, %23 : vector<8x128xf32>
    %cst_13 = arith.constant 0.000000e+00 : f32
    %25 = vector.broadcast %cst_13 : f32 to vector<8x128xf32>
    %26 = arith.maximumf %24, %25 : vector<8x128xf32>
    %27 = vector.extract_strided_slice %26 {offsets = [0, 0], sizes = [8, 32], strides = [1, 1]} : vector<8x128xf32> to vector<8x32xf32>
    %c104 = arith.constant 104 : index
    %c0_14 = arith.constant 0 : index
    %28 = vector.load %arg2[%c104, %c0_14] : memref<208x128xf32, #tpu.memory_space<vmem>>, vector<32x128xf32>
    %cst_15 = arith.constant dense<0.000000e+00> : vector<8x128xf32>
    %29 = tpu.matmul %27, %28, %cst_15 {dimension_numbers = #tpu.dot_dimension_numbers<[1], [0], [0], [1], [0, 0, 1, 1], [], []>} : vector<8x32xf32>, vector<32x128xf32>, vector<8x128xf32> -> vector<8x128xf32>
    %30 = vector.broadcast %13 : vector<1x128xf32> to vector<8x128xf32>
    %31 = arith.addf %29, %30 : vector<8x128xf32>
    %cst_16 = arith.constant 0.000000e+00 : f32
    %32 = vector.broadcast %cst_16 : f32 to vector<8x128xf32>
    %33 = arith.maximumf %31, %32 : vector<8x128xf32>
    %34 = vector.extract_strided_slice %33 {offsets = [0, 0], sizes = [8, 32], strides = [1, 1]} : vector<8x128xf32> to vector<8x32xf32>
    %c8 = arith.constant 8 : index
    %c0_17 = arith.constant 0 : index
    %35 = vector.load %arg2[%c8, %c0_17] : memref<208x128xf32, #tpu.memory_space<vmem>>, vector<32x128xf32>
    %cst_18 = arith.constant dense<0.000000e+00> : vector<8x128xf32>
    %36 = tpu.matmul %34, %35, %cst_18 {dimension_numbers = #tpu.dot_dimension_numbers<[1], [0], [0], [1], [0, 0, 1, 1], [], []>} : vector<8x32xf32>, vector<32x128xf32>, vector<8x128xf32> -> vector<8x128xf32>
    %c2 = arith.constant 2 : index
    %c0_19 = arith.constant 0 : index
    %c0_20 = arith.constant 0 : index
    %37 = vector.load %arg1[%c2, %c0_19, %c0_20] : memref<6x8x128xf32, #tpu.memory_space<vmem>>, vector<1x8x128xf32>
    %38 = vector.shape_cast %37 : vector<1x8x128xf32> to vector<8x128xf32>
    %39 = vector.extract_strided_slice %36 {offsets = [0, 2], sizes = [8, 1], strides = [1, 1]} : vector<8x128xf32> to vector<8x1xf32>
    %40 = vector.broadcast %39 : vector<8x1xf32> to vector<8x128xf32>
    %41 = arith.mulf %38, %40 : vector<8x128xf32>
    %c0_21 = arith.constant 0 : index
    %c0_22 = arith.constant 0 : index
    %c0_23 = arith.constant 0 : index
    %42 = vector.load %arg1[%c0_21, %c0_22, %c0_23] : memref<6x8x128xf32, #tpu.memory_space<vmem>>, vector<1x8x128xf32>
    %43 = vector.shape_cast %42 : vector<1x8x128xf32> to vector<8x128xf32>
    %44 = vector.extract_strided_slice %36 {offsets = [0, 0], sizes = [8, 1], strides = [1, 1]} : vector<8x128xf32> to vector<8x1xf32>
    %45 = vector.broadcast %44 : vector<8x1xf32> to vector<8x128xf32>
    %46 = arith.mulf %43, %45 : vector<8x128xf32>
    %47 = arith.addf %41, %46 : vector<8x128xf32>
    %c1 = arith.constant 1 : index
    %c0_24 = arith.constant 0 : index
    %c0_25 = arith.constant 0 : index
    %48 = vector.load %arg1[%c1, %c0_24, %c0_25] : memref<6x8x128xf32, #tpu.memory_space<vmem>>, vector<1x8x128xf32>
    %49 = vector.shape_cast %48 : vector<1x8x128xf32> to vector<8x128xf32>
    %50 = vector.extract_strided_slice %36 {offsets = [0, 1], sizes = [8, 1], strides = [1, 1]} : vector<8x128xf32> to vector<8x1xf32>
    %51 = vector.broadcast %50 : vector<8x1xf32> to vector<8x128xf32>
    %52 = arith.mulf %49, %51 : vector<8x128xf32>
    %53 = arith.addf %47, %52 : vector<8x128xf32>
    %54 = vector.extract_strided_slice %33 {offsets = [0, 0], sizes = [8, 32], strides = [1, 1]} : vector<8x128xf32> to vector<8x32xf32>
    %c136 = arith.constant 136 : index
    %c0_26 = arith.constant 0 : index
    %55 = vector.load %arg2[%c136, %c0_26] : memref<208x128xf32, #tpu.memory_space<vmem>>, vector<32x128xf32>
    %cst_27 = arith.constant dense<0.000000e+00> : vector<8x128xf32>
    %56 = tpu.matmul %54, %55, %cst_27 {dimension_numbers = #tpu.dot_dimension_numbers<[1], [0], [0], [1], [0, 0, 1, 1], [], []>} : vector<8x32xf32>, vector<32x128xf32>, vector<8x128xf32> -> vector<8x128xf32>
    %57 = vector.broadcast %14 : vector<1x128xf32> to vector<8x128xf32>
    %58 = arith.addf %56, %57 : vector<8x128xf32>
    %cst_28 = arith.constant 0.000000e+00 : f32
    %59 = vector.broadcast %cst_28 : f32 to vector<8x128xf32>
    %60 = arith.maximumf %58, %59 : vector<8x128xf32>
    %61 = vector.extract_strided_slice %60 {offsets = [0, 0], sizes = [8, 32], strides = [1, 1]} : vector<8x128xf32> to vector<8x32xf32>
    %c168 = arith.constant 168 : index
    %c0_29 = arith.constant 0 : index
    %62 = vector.load %arg2[%c168, %c0_29] : memref<208x128xf32, #tpu.memory_space<vmem>>, vector<32x128xf32>
    %cst_30 = arith.constant dense<0.000000e+00> : vector<8x128xf32>
    %63 = tpu.matmul %61, %62, %cst_30 {dimension_numbers = #tpu.dot_dimension_numbers<[1], [0], [0], [1], [0, 0, 1, 1], [], []>} : vector<8x32xf32>, vector<32x128xf32>, vector<8x128xf32> -> vector<8x128xf32>
    %64 = vector.broadcast %15 : vector<1x128xf32> to vector<8x128xf32>
    %65 = arith.addf %63, %64 : vector<8x128xf32>
    %66 = tpu.iota {dimensions = array<i32: 1>} : vector<8x128xi32>
    %cst_31 = arith.constant 5.000000e-01 : f32
    %67 = vector.broadcast %cst_31 : f32 to vector<8x128xf32>
    %68 = arith.cmpf ogt, %7, %67 : vector<8x128xf32>
    %cst_32 = arith.constant 0xFF800000 : f32
    %69 = vector.broadcast %cst_32 : f32 to vector<8x128xf32>
    %70 = arith.select %68, %69, %53 : vector<8x128xi1>, vector<8x128xf32>
    %c8_i32 = arith.constant 8 : i32
    %71 = vector.broadcast %c8_i32 : i32 to vector<8x128xi32>
    %72 = arith.cmpi slt, %66, %71 : vector<8x128xi32>
    %73 = arith.select %72, %70, %65 : vector<8x128xi1>, vector<8x128xf32>
    %c0_33 = arith.constant 0 : index
    %c0_34 = arith.constant 0 : index
    %74 = vector.load %arg3[%c0_33, %c0_34] : memref<8x128xf32, #tpu.memory_space<vmem>>, vector<8x128xf32>
    tpu.vector_store %arg3[%c0_33, %c0_34], %73 {strides = array<i32>} : memref<8x128xf32, #tpu.memory_space<vmem>>, vector<8x128xf32>,
    return
  }
  func.func @transform_0(%arg0: i32) -> (i32, i32, i32) {
    %c0_i32 = arith.constant 0 : i32
    %c0_i32_0 = arith.constant 0 : i32
    %c0_i32_1 = arith.constant 0 : i32
    return %c0_i32, %arg0, %c0_i32_0 : i32, i32, i32
  }
  func.func @transform_1(%arg0: i32) -> (i32, i32) {
    %c0_i32 = arith.constant 0 : i32
    %c0_i32_0 = arith.constant 0 : i32
    %c0_i32_1 = arith.constant 0 : i32
    return %c0_i32, %c0_i32_0 : i32, i32
  }
  func.func @transform_2(%arg0: i32) -> (i32, i32) {
    %c0_i32 = arith.constant 0 : i32
    %c0_i32_0 = arith.constant 0 : i32
    return %arg0, %c0_i32 : i32, i32
  }
}

</mosaic_0001>

<bundles_post_ra>
// kernel: forward.1
= control target key start
LH: loop header
LB: loop body
LE: loop exit
PB: predicated region body
PF: predicated region fallthrough
CT: control target
= control target key end

     0   :  { %s1132_s9 = smov 0   ;;  %s1134_s10 = smov 0   ;;  %s1334_s0 = inlined_call_operand.vmem [shape: f32[6,16,128], index: 0, kind: input, shape index: {}]   ;;  %s1335_s1 = inlined_call_operand.vmem [shape: f32[208,128], index: 1, kind: input, shape index: {}]   ;;  %s1336_s2 = inlined_call_operand.vmem [shape: f32[16,128], index: 2, kind: output, shape index: {}]  }
   0x1   :  { %s1136_s11 = smov 0  }
   0x2 LB: > { %s921_s12 = sadd.s32 4294967295, %s1110_s11   ;;  %s1149_s13 = sadd.s32 1, %s1110_s11   ;;  %s1110_s11 = sphi %s1136_s11, %s1339_s11   ;;  %s1106_s10 = sphi %s1134_s10, %s1338_s10   ;;  %s1102_s9 = sphi %s1132_s9, %s1337_s9  }
   0x3   : > { %s16_s14 = ssub.s32 %s1110_s11, %s1149_s13  ;;  %s19_s15 = sadd.s32 1, %s1106_s10 }
   0x4   : > { %p17_p0 = scmp.eq.s32.totalorder %s16_s14, 0  ;;  %p26_p1 = scmp.ne.s32.totalorder %s1106_s10, %s1102_s9 }
   0x5   : > { %p27_p2 = scmp.eq.s32.totalorder %s1110_s11, 0  ;;  %p924_p4 = scmp.ge.s32.totalorder %s1110_s11, 2 }
   0x6   : > { %s1158_s16 = scalar_select %p17_p0, %s1106_s10, %s19_s15  }
   0x7   : > { %p28_p3 = por %p27_p2, %p26_p1  ;;  %102 = sbr.rel (%p924_p4) target bundleno = 19 (0x13), region = 20 }
   0xc   : > { %105 = sbr.rel (!%p28_p3) target bundleno = 19 (0x13), region = 24  ;;  %s107_s17 = sand.u32 (%p28_p3), 1, %s1106_s10  }
   0xd   : > { %s925_s18 = sshll.u32 (%p28_p3), %s1110_s11, 3  ;;  %s1053_s19 = smul.u32 (%p28_p3), 48, %s107_s17 }
   0xe   : > { %s111_s22 = scalar_lea.vmem (%p28_p3), %s1334_s0, %s925_s18 }
   0xf   : > { %v150_v0 = vld [vmem:[%s111_s22] sm:$0xff] (%p28_p3)  ;;  %v152_v1 = vld [vmem:[%s111_s22 + $0x10] sm:$0xff] (%p28_p3)  ;;  %s109_s23 = scalar_lea.vmem (%p28_p3), [#allocation2], %s1053_s19 }
  0x10   : > { %v154_v2 = vld [vmem:[%s111_s22 + $0x20] sm:$0xff] (%p28_p3)  ;;  %v156_v3 = vld [vmem:[%s111_s22 + $0x30] sm:$0xff] (%p28_p3)  ;;  %151 = vst [vmem:[%s109_s23] sm:$0xff] (%p28_p3), %v150_v0  ;;  %153 = vst [vmem:[%s109_s23 + $0x8] sm:$0xff] (%p28_p3), %v152_v1 }
  0x11   : > { %v158_v4 = vld [vmem:[%s111_s22 + $0x40] sm:$0xff]  ;;  %v160_v5 = vld [vmem:[%s111_s22 + $0x50] sm:$0xff]  ;;  %155 = vst [vmem:[%s109_s23 + $0x10] sm:$0xff] %v154_v2  ;;  %157 = vst [vmem:[%s109_s23 + $0x18] sm:$0xff] %v156_v3 }
  0x12   : > { %159 = vst [vmem:[%s109_s23 + $0x20] sm:$0xff] %v158_v4  ;;  %161 = vst [vmem:[%s109_s23 + $0x28] sm:$0xff] %v160_v5 }
  0x13 PF: > { %p926_p5 = scmp.ge.s32.totalorder %s1110_s11, 1  ;;  %p166_p6 = scmp.lt.s32.totalorder %s1110_s11, 3 }
  0x15   : > { %p167_p7 = pnand %p926_p5, %p166_p6 }
  0x16   : > { %s173_s26 = sand.u32 (!%p167_p7), 1, %s1102_s9   ;;  %p193_p8 = scmp.lt.s32.totalorder (!%p167_p7), %s921_s12, 1 }
  0x17   : > { %170 = sbr.rel (%p167_p7) target bundleno = 1016 (0x3f8), region = 62 }
  0x18   : > { %s1054_s27 = smul.u32 (!%p167_p7), 48, %s173_s26 }
  0x1a   : > { %s1184_s4 = scalar_lea.vmem (!%p167_p7), [#allocation2], %s1054_s27 }
  0x1c   : > { %v203_v6 = vld [vmem:[%s1335_s1] sm:$0xff]  ;;  %v1112_v7 = vmov 0.0   ;;  %vm1113_vm0 = vmmov 0   ;;  %vm204_vm1 = vcmask 64512   ;;  %v928_v10 = vld [vmem:[%s1184_s4 + $0x18] sm:$0xff]  ;;  %v357_v14 = vld [vmem:[%s1335_s1 + $0x50] sm:$0xff]  ;;  %v507_v27 = vlaneseq }
  0x1d   : > { %977 = vmatprep.subr.mxu0 %v1112_v7  ;;  %982 = vmatprep.subr.mxu1 %v1112_v7  ;;  %v359_v8 = vld [vmem:[%s1335_s1 + $0x60] sm:$0xff]  ;;  %v358_v12 = vld [vmem:[%s1335_s1 + $0x58] sm:$0xff]  ;;  %v353_v15 = vld [vmem:[%s1335_s1 + $0x30] sm:$0xff]  ;;  %vm360_vm2 = vcmask 261120   ;;  %v1114_v46 = vmov 1   ;;  %v1115_v47 = vmov 2  }
  0x1e   : > { %978 = vmatpush3.msra.mxu0 %v203_v6  ;;  %979 = vmatprep.mubr.msk.f32.mxu0 %vm1113_vm0, %v1112_v7  ;;  %v355_v9 = vld [vmem:[%s1335_s1 + $0x40] sm:$0xff]  ;;  %v354_v13 = vld [vmem:[%s1335_s1 + $0x38] sm:$0xff]  ;;  %v356_v16 = vld [vmem:[%s1335_s1 + $0x48] sm:$0xff]  ;;  %v1247_v28 = vshrl.u32 %v507_v27, 7  ;;  %v1116_v2 = vmov 0   ;;  %s1341_s12 = smov (!%p193_p8, %s921_s12), 1 }
  0x1f   : > { %983 = vmatpush3.msra.mxu1 %v203_v6  ;;  %984 = vmatprep.mubr.msk.f32.mxu1 %vm1113_vm0, %v1112_v7  ;;  %v929_v11 = vld [vmem:[%s1184_s4 + $0x20] sm:$0xff]  ;;  %v352_v17 = vld [vmem:[%s1335_s1 + $0x28] sm:$0xff]  ;;  %v515_v23 = vld [vmem:[%s1335_s1 + $0x78] sm:$0xff]  ;;  %s927_s7 = sshll.u32 %s1341_s12, 3 }
  0x20   : > { %987 = vmatprep.subr.mxu0 %v1112_v7  ;;  %998 = vmatprep.subr.mxu1 %v1112_v7  ;;  %v516_v22 = vld [vmem:[%s1335_s1 + $0x80] sm:$0xff]  ;;  %v514_v24 = vld [vmem:[%s1335_s1 + $0x70] sm:$0xff]  ;;  %v513_v25 = vld [vmem:[%s1335_s1 + $0x68] sm:$0xff]  ;;  %v509_v29 = vsub.s32 0, %v1247_v28  ;;  %v519_v48 = vsub.s32 1, %v1247_v28  ;;  %v701_v58 = vsub.s32 2, %v1247_v28  ;;  %s196_s14 = scalar_lea.vmem %s1336_s2, %s927_s7 }
  0x21   : > { %980 = vmatmul.mubr.msk.f32.vlgmr.msra.gmra.mxu0 %vm204_vm1, %v928_v10  ;;  %985 = vmatmul.mubr.msk.f32.vlgmr.msra.gmra.mxu1 %vm204_vm1, %v929_v11  ;;  %v598_v26 = vld [vmem:[%s1335_s1 + $0x20] sm:$0xff]  ;;  %v1253_v30 = vld [vmem:[%s1335_s1 + $0xc8] sm:$0xff]  ;;  %v597_v40 = vld [vmem:[%s1335_s1 + $0x18] sm:$0xff]  ;;  %v780_v11 = vsub.s32 3, %v1247_v28 }
  0x22   : > { %988 = vmatpush3.msra.mxu0 %v359_v8  ;;  %999 = vmatpush3.msra.mxu1 %v355_v9  ;;  %v510_v31 = vrot.slane %v1253_v30, %v509_v29  ;;  %v698_v39 = vld [vmem:[%s1335_s1 + $0xa0] sm:$0xff]  ;;  %v697_v41 = vld [vmem:[%s1335_s1 + $0x98] sm:$0xff]  ;;  %v596_v42 = vld [vmem:[%s1335_s1 + $0x10] sm:$0xff]  ;;  %v520_v49 = vrot.slane %v1253_v30, %v519_v48  ;;  %v702_v59 = vrot.slane %v1253_v30, %v701_v58 }
  0x23   : > { %989 = vmatprep.subr.mxu0 %v1112_v7  ;;  %1000 = vmatprep.subr.mxu1 %v1112_v7  ;;  %v696_v43 = vld [vmem:[%s1335_s1 + $0x90] sm:$0xff]  ;;  %v595_v44 = vld [vmem:[%s1335_s1 + $0x8] sm:$0xff]  ;;  %v777_v54 = vld [vmem:[%s1335_s1 + $0xc0] sm:$0xff] }
  0x24   : > { %990 = vmatpush3.msra.mxu0 %v358_v12  ;;  %1001 = vmatpush3.msra.mxu1 %v354_v13  ;;  %v695_v45 = vld [vmem:[%s1335_s1 + $0x88] sm:$0xff]  ;;  %v776_v55 = vld [vmem:[%s1335_s1 + $0xb8] sm:$0xff]  ;;  %v775_v56 = vld [vmem:[%s1335_s1 + $0xb0] sm:$0xff] }
  0x25   : > { %991 = vmatprep.subr.mxu0 %v1112_v7  ;;  %1002 = vmatprep.subr.mxu1 %v1112_v7  ;;  %v774_v57 = vld [vmem:[%s1335_s1 + $0xa8] sm:$0xff]  ;;  %v680_v4 = vld [vmem:[%s1184_s4] sm:$0xff]  ;;  %v937_v6 = vld [vmem:[%s1184_s4 + $0x10] sm:$0xff] }
  0x26   : > { %992 = vmatpush3.msra.mxu0 %v357_v14  ;;  %1003 = vmatpush3.msra.mxu1 %v353_v15  ;;  %v938_v9 = vld [vmem:[%s1184_s4 + $0x8] sm:$0xff]  ;;  %v856_v15 = vand.u32 127, %v507_v27 }
  0x27   : > { %993 = vmatprep.subr.mxu0 %v1112_v7  ;;  %1004 = vmatprep.subr.mxu1 %v1112_v7  ;;  %v930_v14 = vld [vmem:[%s1184_s4 + $0x28] sm:$0xff] }
  0x28   : > { %995 = vmatprep.mubr.msk.f32.mxu0 %vm1113_vm0, %v1112_v7  ;;  %1006 = vmatprep.mubr.msk.f32.mxu1 %vm1113_vm0, %v1112_v7  ;;  %vm857_vm3 = vcmp.gt.f32.partialorder %v930_v14, 0.5  ;;  %vm859_vm4 = vcmp.lt.s32.totalorder %v856_v15, 8 }
  0x29   : > { %994 = vmatpush3.msra.mxu0 %v356_v16  ;;  %1005 = vmatpush3.msra.mxu1 %v352_v17  ;;  %v781_v16 = vrot.slane %v1253_v30, %v780_v11 }
  0x2a   : > { %1009 = vmatprep.subr.mxu0 %v1112_v7  ;;  %1020 = vmatprep.subr.mxu1 %v1112_v7 }
  0x2b   : > { %1086 = vset.pattern.permute.xlu1 %v1114_v46  ;;  %1084 = vset.pattern.permute.xlu0 %v1115_v47 }
  0xe1   : > { %v274_v18 = vpop.f32.mrf.mxu0  ;;  %v347_v19 = vpop.f32.mrf.mxu1 }
  0xe2   : > { %996 = vmatmul.mubr.msk.f32.vlgmr.msra.gmra.mxu0 %vm360_vm2, %v347_v19  ;;  %1007 = vmatmul.mubr.msk.f32.vlgmr.msra.gmra.mxu1 %vm360_vm2, %v274_v18 }
  0xe3   : > { %v981_v20 = vpop.f32.mrf.mxu0  ;;  %v986_v21 = vpop.f32.mrf.mxu1  ;;  %1017 = vmatprep.mubr.msk.f32.mxu0 %vm1113_vm0, %v1112_v7  ;;  %1028 = vmatprep.mubr.msk.f32.mxu1 %vm1113_vm0, %v1112_v7 }
  0xe4   : > { %1010 = vmatpush3.msra.mxu0 %v516_v22  ;;  %1021 = vmatpush3.msra.mxu1 %v598_v26 }
  0xe5   : > { %1011 = vmatprep.subr.mxu0 %v1112_v7  ;;  %1022 = vmatprep.subr.mxu1 %v1112_v7 }
  0xe6   : > { %1012 = vmatpush3.msra.mxu0 %v515_v23  ;;  %1023 = vmatpush3.msra.mxu1 %v597_v40 }
  0xe7   : > { %1013 = vmatprep.subr.mxu0 %v1112_v7  ;;  %1024 = vmatprep.subr.mxu1 %v1112_v7 }
  0xe8   : > { %1014 = vmatpush3.msra.mxu0 %v514_v24  ;;  %1025 = vmatpush3.msra.mxu1 %v596_v42 }
  0xe9   : > { %1015 = vmatprep.subr.mxu0 %v1112_v7  ;;  %1026 = vmatprep.subr.mxu1 %v1112_v7 }
  0xea   : > { %1016 = vmatpush3.msra.mxu0 %v513_v25  ;;  %1027 = vmatpush3.msra.mxu1 %v595_v44 }
  0xeb   : > { %1031 = vmatprep.subr.mxu0 %v1112_v7  ;;  %1042 = vmatprep.subr.mxu1 %v1112_v7 }
 0x1a2   : > { %v430_v32 = vpop.f32.mrf.mxu0  ;;  %v503_v33 = vpop.f32.mrf.mxu1 }
 0x1a3   : > { %v504_v34 = vadd.f32 %v503_v33, %v430_v32 }
 0x1a4   : > { %v997_v35 = vpop.f32.mrf.mxu0  ;;  %v1008_v36 = vpop.f32.mrf.mxu1 }
 0x1a5   : > { %v511_v37 = vadd.f32 %v510_v31, %v504_v34 }
 0x1a7   : > { %v512_v38 = vmax.f32 %v511_v37, 0.0 }
 0x1a9   : > { %1018 = vmatmul.mubr.msk.f32.vlgmr.msra.gmra.mxu0 %vm360_vm2, %v512_v38 }
 0x1aa   : > { %1032 = vmatpush3.msra.mxu0 %v698_v39  ;;  %1039 = vmatprep.mubr.msk.f32.mxu0 %vm1113_vm0, %v1112_v7 }
 0x1ab   : > { %1033 = vmatprep.subr.mxu0 %v1112_v7 }
 0x1ac   : > { %1034 = vmatpush3.msra.mxu0 %v697_v41 }
 0x1ad   : > { %1035 = vmatprep.subr.mxu0 %v1112_v7 }
 0x1ae   : > { %1036 = vmatpush3.msra.mxu0 %v696_v43 }
 0x1af   : > { %1037 = vmatprep.subr.mxu0 %v1112_v7 }
 0x1b0   : > { %1038 = vmatpush3.msra.mxu0 %v695_v45 }
 0x269   : > { %v590_v50 = vpop.f32.mrf.mxu0 }
 0x26a   : > { %v591_v51 = vadd.f32 %v590_v50, %v520_v49 }
 0x26b   : > { %v1019_v52 = vpop.f32.mrf.mxu0 }
 0x26c   : > { %v594_v53 = vmax.f32 %v591_v51, 0.0 }
 0x26e   : > { %1029 = vmatmul.mubr.msk.f32.vlgmr.msra.gmra.mxu1 %vm360_vm2, %v594_v53  ;;  %1040 = vmatmul.mubr.msk.f32.vlgmr.msra.gmra.mxu0 %vm360_vm2, %v594_v53 }
 0x26f   : > { %1043 = vmatpush3.msra.mxu1 %v777_v54  ;;  %1050 = vmatprep.mubr.msk.f32.mxu1 %vm1113_vm0, %v1112_v7 }
 0x270   : > { %1044 = vmatprep.subr.mxu1 %v1112_v7 }
 0x271   : > { %1045 = vmatpush3.msra.mxu1 %v776_v55 }
 0x272   : > { %1046 = vmatprep.subr.mxu1 %v1112_v7 }
 0x273   : > { %1047 = vmatpush3.msra.mxu1 %v775_v56 }
 0x274   : > { %1048 = vmatprep.subr.mxu1 %v1112_v7 }
 0x275   : > { %1049 = vmatpush3.msra.mxu1 %v774_v57 }
 0x32e   : > { %v668_v60 = vpop.f32.mrf.mxu1  ;;  %v769_v61 = vpop.f32.mrf.mxu0 }
 0x32f   : > { %v770_v62 = vadd.f32 %v769_v61, %v702_v59  ;;  %690 = vperm.xlu1 %1086, %v668_v60   ;;  %676 = vperm.xlu0 %1084, %v668_v60  }
 0x330   : > { %v1030_v63 = vpop.f32.mrf.mxu1  ;;  %v1041_v0 = vpop.f32.mrf.mxu0 }
 0x331   : > { %v773_v1 = vmax.f32 %v770_v62, 0.0 }
 0x333   : > { %1085 = vset.pattern.permute.xlu0 %v1116_v2  ;;  %1051 = vmatmul.mubr.msk.f32.vlgmr.msra.gmra.mxu1 %vm360_vm2, %v773_v1 }
 0x334   : > { %682 = vperm.xlu0 %1085, %v668_v60  }
 0x338   : > { %1087 = vset.pattern.permute.xlu0 %v1114_v46 }
 0x3aa   : > { %v677_v3 = vpop.permute.xlu0 %676  ;;  %v691_v10 = vpop.permute.xlu1 %690 }
 0x3ab   : > { %v679_v8 = vmul.f32 %v937_v6, %v677_v3  ;;  %v693_v13 = vmul.f32 %v938_v9, %v691_v10 }
 0x3af   : > { %v683_v5 = vpop.permute.xlu0 %682 }
 0x3b0   : > { %v685_v7 = vmul.f32 %v683_v5, %v680_v4 }
 0x3b2   : > { %v686_v12 = vadd.f32 %v685_v7, %v679_v8 }
 0x3b4   : > { %v694_v17 = vadd.f32 %v693_v13, %v686_v12 }
 0x3b6   : > { %v858_v20 = vsel %vm857_vm3, -inf, %v694_v17 }
 0x3f3   : > { %v851_v18 = vpop.f32.mrf.mxu1 }
 0x3f4   : > { %v852_v19 = vadd.f32 %v851_v18, %v781_v16 }
 0x3f5   : > { %v1052_v21 = vpop.f32.mrf.mxu1 }
 0x3f6   : > { %v860_v22 = vsel %vm859_vm4, %v858_v20, %v852_v19 }
 0x3f7   : > { %861 = vst [vmem:[%s196_s14] sm:$0xff] %v860_v22 }
 0x3f8 PF: > { %p9_p9 = scmp.ge.s32.totalorder %s1149_s13, 4   ;;  %s1337_s9 = smov %s1106_s10 }
 0x3f9   : > { %s1338_s10 = smov %s1158_s16  ;;  %s1339_s11 = smov %s1149_s13 }
 0x3fa   :  { %11 = sbr.rel (!%p9_p9) target bundleno = 2 (0x2), region = 106 }

</bundles_post_ra>
